<compile_context>
chip_gen: v5e
topology: v5e:2x2
jax: 0.10.0
libtpu: 0.0.40
codegen_flags: <defaults>
</compile_context>

<pallas_src>
import functools

import jax
import jax.numpy as jnp
from jax import lax
from jax.experimental import pallas as pl
from jax.experimental.pallas import tpu as pltpu

HIDDEN_DIM = 32
KERNEL_SCALE = 1.0
SUBLANE = 8


def _round_up(x, m):
    return ((x + m - 1) // m) * m


def _dkr_kernel(xy_ref, yt_ref, w_ref, out_ref, *,
                g, n, m, d_pad, h_pad,
                off_b1, off_w2, off_b2, off_w3, off_b3,
                inv_two_sigma_sq):
    """One grid step = G problem instances.

    xy_ref : [G, N+M, d_pad]   query rows (first N) and support rows (last M)
    yt_ref : [G, M, T]         support targets
    w_ref  : [R, h_pad]        packed MLP parameters (resident across steps)
    out_ref: [G, N, T]         predictions
    """
    # Unpack the parameter slab (static, sublane-aligned offsets).
    w1 = w_ref[0:d_pad, :]                    # [d_pad, h_pad]
    b1 = w_ref[off_b1:off_b1 + 1, :]          # [1, h_pad]
    w2 = w_ref[off_w2:off_w2 + h_pad, :]      # [h_pad, h_pad]
    b2 = w_ref[off_b2:off_b2 + 1, :]          # [1, h_pad]
    w3 = w_ref[off_w3:off_w3 + h_pad, :]      # [h_pad, h_pad]
    b3 = w_ref[off_b3:off_b3 + 1, :]          # [1, h_pad]

    # Single fused MLP pass over all G*(N+M) rows of this step.
    rows = g * (n + m)
    a = xy_ref[...].reshape(rows, d_pad)
    z = jnp.maximum(jnp.dot(a, w1, preferred_element_type=jnp.float32) + b1, 0.0)
    z = jnp.maximum(jnp.dot(z, w2, preferred_element_type=jnp.float32) + b2, 0.0)
    z = jnp.maximum(jnp.dot(z, w3, preferred_element_type=jnp.float32) + b3, 0.0)

    f = z.reshape(g, n + m, h_pad)
    xf = f[:, :n, :]                          # [G, N, h_pad]
    yf = f[:, n:, :]                          # [G, M, h_pad]

    # logits = (2 x.y - ||y||^2) / (2 sigma^2); the per-row ||x||^2 term is a
    # constant under row-normalization and is dropped; per-row max subtraction
    # gives numerical safety (also cancels under normalization).
    cross = lax.dot_general(xf, yf, (((2,), (2,)), ((0,), (0,))),
                            preferred_element_type=jnp.float32)      # [G, N, M]
    y2 = jnp.sum(yf * yf, axis=2)[:, None, :]                        # [G, 1, M]
    logits = (2.0 * cross - y2) * inv_two_sigma_sq                    # [G, N, M]
    logits = logits - jnp.max(logits, axis=2, keepdims=True)
    kmat = jnp.exp(logits)                                            # [G, N, M]

    # Small-T path: numerator is a tiny batched dot, denominator is an
    # in-kernel last-axis sum (XLU).  den >= 1 after max subtraction.
    num = lax.dot_general(kmat, yt_ref[...], (((2,), (1,)), ((0,), (0,))),
                          preferred_element_type=jnp.float32)         # [G, N, T]
    den = jnp.sum(kmat, axis=2, keepdims=True)                         # [G, N, 1]
    out_ref[...] = num * pl.reciprocal(den, approx=False)


def _pack_params(params, d, h, d_pad, h_pad):
    """Pack w1,b1,w2,b2,w3,b3 into one sublane-aligned [R, h_pad] f32 slab.
    Rows are padded to d_pad / h_pad / SUBLANE and columns to h_pad with zeros
    so every slice in the kernel is (8,128)-aligned and padded contractions
    are exact."""
    off_b1 = d_pad
    off_w2 = off_b1 + SUBLANE
    off_b2 = off_w2 + h_pad
    off_w3 = off_b2 + SUBLANE
    off_b3 = off_w3 + h_pad
    rows = off_b3 + SUBLANE

    def seg(a, r):
        a = jnp.asarray(a, jnp.float32).reshape(-1, h)
        return jnp.pad(a, ((0, r - a.shape[0]), (0, h_pad - h)))

    slab = jnp.concatenate([
        seg(params["w1"], d_pad),
        seg(params["b1"], SUBLANE),
        seg(params["w2"], h_pad),
        seg(params["b2"], SUBLANE),
        seg(params["w3"], h_pad),
        seg(params["b3"], SUBLANE),
    ], axis=0)
    offs = dict(off_b1=off_b1, off_w2=off_w2, off_b2=off_b2,
                off_w3=off_w3, off_b3=off_b3)
    return slab, offs, rows


def deep_kernel_regression_batched(X, Y, Y_target, params,
                                   kernel_scale=KERNEL_SCALE,
                                   instances_per_block=None):
    """B independent (X, Y, Y_target) instances; G instances per grid step
    (default G = ceil(B/2) -> at most 2 fat steps, one per v7x TensorCore)."""
    B, N, D = X.shape
    _, M, _ = Y.shape
    T = Y_target.shape[-1]
    H = params["w1"].shape[1]

    d_pad = _round_up(D, SUBLANE)
    h_pad = _round_up(H, SUBLANE)

    if instances_per_block is None:
        instances_per_block = max(1, (B + 1) // 2)
    G = min(max(1, instances_per_block), B)
    num_blocks = pl.cdiv(B, G)
    B_pad = num_blocks * G

    slab, offs, R = _pack_params(params, D, H, d_pad, h_pad)

    # Zero-pad the feature dim to d_pad and concatenate X|Y along rows so each
    # grid step does a single fused MLP pass on G*(N+M) rows.  Padded
    # instances (if B % G != 0) are harmless (den >= 1) and sliced off below.
    Xp = jnp.pad(X.astype(jnp.float32),
                 ((0, B_pad - B), (0, 0), (0, d_pad - D)))
    Yp = jnp.pad(Y.astype(jnp.float32),
                 ((0, B_pad - B), (0, 0), (0, d_pad - D)))
    XY = jnp.concatenate([Xp, Yp], axis=1)            # [B_pad, N+M, d_pad]
    Yt = jnp.pad(Y_target.astype(jnp.float32),
                 ((0, B_pad - B), (0, 0), (0, 0)))    # [B_pad, M, T]

    kernel = functools.partial(
        _dkr_kernel, g=G, n=N, m=M, d_pad=d_pad, h_pad=h_pad,
        inv_two_sigma_sq=1.0 / (2.0 * float(kernel_scale) ** 2), **offs)

    out = pl.pallas_call(
        kernel,
        out_shape=jax.ShapeDtypeStruct((B_pad, N, T), jnp.float32),
        grid=(num_blocks,),
        in_specs=[
            pl.BlockSpec((G, N + M, d_pad), lambda b: (b, 0, 0)),
            pl.BlockSpec((G, M, T), lambda b: (b, 0, 0)),
            pl.BlockSpec((R, h_pad), lambda b: (0, 0)),   # resident weight slab
        ],
        out_specs=pl.BlockSpec((G, N, T), lambda b: (b, 0, 0)),
        compiler_params=pltpu.CompilerParams(
            dimension_semantics=("parallel",)),
    )(XY, Yt, slab)

    return out[:B]


def deep_kernel_regression(X, Y, Y_target, params, kernel_scale=KERNEL_SCALE):
    """Single-instance API matching the torch module's forward signature."""
    out = deep_kernel_regression_batched(X[None], Y[None], Y_target[None],
                                         params, kernel_scale)
    return out[0]


def init_params(key, input_dim, hidden_dim=HIDDEN_DIM):
    """Deterministic PyTorch-style init: U(-1/sqrt(fan_in), 1/sqrt(fan_in)).
    Weights are stored as [in, out] (transposed vs. torch's [out, in])."""
    ks = jax.random.split(key, 6)

    def lin(kw, kb, fan_in, fan_out):
        bound = 1.0 / jnp.sqrt(jnp.float32(fan_in))
        w = jax.random.uniform(kw, (fan_in, fan_out), jnp.float32, -bound, bound)
        b = jax.random.uniform(kb, (fan_out,), jnp.float32, -bound, bound)
        return w, b

    w1, b1 = lin(ks[0], ks[1], input_dim, hidden_dim)
    w2, b2 = lin(ks[2], ks[3], hidden_dim, hidden_dim)
    w3, b3 = lin(ks[4], ks[5], hidden_dim, hidden_dim)
    return {"w1": w1, "b1": b1, "w2": w2, "b2": b2, "w3": w3, "b3": b3}


def _reference(X, Y, Y_target, params, kernel_scale=KERNEL_SCALE):
    """Pure-JAX reference mirroring the torch forward (diff/broadcast form)."""
    def mlp(a):
        h = jnp.maximum(a @ params["w1"] + params["b1"], 0.0)
        h = jnp.maximum(h @ params["w2"] + params["b2"], 0.0)
        h = jnp.maximum(h @ params["w3"] + params["b3"], 0.0)
        return h

    xf, yf = mlp(X), mlp(Y)
    diff = xf[:, None, :] - yf[None, :, :]
    sqd = jnp.sum(diff ** 2, axis=2)
    kmat = jnp.exp(-sqd / (2.0 * kernel_scale ** 2))
    weights = kmat / jnp.sum(kmat, axis=1, keepdims=True)
    return weights @ Y_target


if __name__ == "__main__":
    key = jax.random.PRNGKey(0)
    k_x, k_y, k_t, k_p = jax.random.split(key, 4)

    # Small shapes: 4 problem instances, 8 query pts, 8 support pts,
    # 16-d observations, scalar reward target, hidden=32.
    B, N, M, D, T = 4, 8, 8, 16, 1

    X = jax.random.normal(k_x, (B, N, D), jnp.float32)
    Y = jax.random.normal(k_y, (B, M, D), jnp.float32)
    Y_target = jax.random.normal(k_t, (B, M, T), jnp.float32)

    params = init_params(k_p, D, HIDDEN_DIM)

    # Batched path: 2 fat grid steps of 2 instances each ("parallel" axis).
    preds = deep_kernel_regression_batched(X, Y, Y_target, params, KERNEL_SCALE)
    preds = jax.block_until_ready(preds)
    assert preds.shape == (B, N, T)

    ref = jax.vmap(
        lambda x, y, yt: _reference(x, y, yt, params, KERNEL_SCALE))(X, Y, Y_target)
    assert jnp.allclose(preds, ref, atol=1e-4, rtol=1e-4), "batched mismatch vs. reference"

    # Single-instance path (matches the torch module's forward signature).
    p1 = deep_kernel_regression(X[0], Y[0], Y_target[0], params, KERNEL_SCALE)
    p1 = jax.block_until_ready(p1)
    assert p1.shape == (N, T)
    assert jnp.allclose(p1, ref[0], atol=1e-4, rtol=1e-4), "single-instance mismatch vs. reference"

    print("KERNEL_OK")
</pallas_src>

<mosaic_0001>
module attributes {stable_mosaic.version = 11 : i64} {
  func.func @_dkr_kernel(%arg0: i32, %arg1: memref<2x16x16xf32, #tpu.memory_space<vmem>>, %arg2: memref<2x8x1xf32, #tpu.memory_space<vmem>>, %arg3: memref<104x32xf32, #tpu.memory_space<vmem>>, %arg4: memref<2x8x1xf32, #tpu.memory_space<vmem>>) attributes {dimension_semantics = [#tpu.dimension_semantics<parallel>], iteration_bounds = array<i64: 2>, scalar_prefetch = 0 : i64, scratch_operands = 0 : i64, tpu.core_type = #tpu.core_type<tc>, window_params = [{transform_indices = @transform_0, window_bounds = array<i64: 2, 16, 16>}, {transform_indices = @transform_1, window_bounds = array<i64: 2, 8, 1>}, {pipeline_mode = #tpu.pipeline_mode<synchronous>, transform_indices = @transform_2, window_bounds = array<i64: 104, 32>}, {transform_indices = @transform_3, window_bounds = array<i64: 2, 8, 1>}]} {
    %c0 = arith.constant 0 : index
    %c0_0 = arith.constant 0 : index
    %0 = vector.load %arg3[%c0, %c0_0] : memref<104x32xf32, #tpu.memory_space<vmem>>, vector<16x32xf32>
    %c16 = arith.constant 16 : index
    %c0_1 = arith.constant 0 : index
    %1 = vector.load %arg3[%c16, %c0_1] : memref<104x32xf32, #tpu.memory_space<vmem>>, vector<1x32xf32>
    %c24 = arith.constant 24 : index
    %c0_2 = arith.constant 0 : index
    %2 = vector.load %arg3[%c24, %c0_2] : memref<104x32xf32, #tpu.memory_space<vmem>>, vector<32x32xf32>
    %c56 = arith.constant 56 : index
    %c0_3 = arith.constant 0 : index
    %3 = vector.load %arg3[%c56, %c0_3] : memref<104x32xf32, #tpu.memory_space<vmem>>, vector<1x32xf32>
    %c64 = arith.constant 64 : index
    %c0_4 = arith.constant 0 : index
    %4 = vector.load %arg3[%c64, %c0_4] : memref<104x32xf32, #tpu.memory_space<vmem>>, vector<32x32xf32>
    %c96 = arith.constant 96 : index
    %c0_5 = arith.constant 0 : index
    %5 = vector.load %arg3[%c96, %c0_5] : memref<104x32xf32, #tpu.memory_space<vmem>>, vector<1x32xf32>
    %c0_6 = arith.constant 0 : index
    %c0_7 = arith.constant 0 : index
    %c0_8 = arith.constant 0 : index
    %6 = vector.load %arg1[%c0_6, %c0_7, %c0_8] : memref<2x16x16xf32, #tpu.memory_space<vmem>>, vector<2x16x16xf32>
    %7 = vector.shape_cast %6 : vector<2x16x16xf32> to vector<32x16xf32>
    %cst = arith.constant dense<0.000000e+00> : vector<32x32xf32>
    %8 = tpu.matmul %7, %0, %cst {dimension_numbers = #tpu.dot_dimension_numbers<[1], [0], [0], [1], [0, 0, 1, 1], [], []>} : vector<32x16xf32>, vector<16x32xf32>, vector<32x32xf32> -> vector<32x32xf32>
    %9 = vector.broadcast %1 : vector<1x32xf32> to vector<32x32xf32>
    %10 = arith.addf %8, %9 : vector<32x32xf32>
    %cst_9 = arith.constant 0.000000e+00 : f32
    %11 = vector.broadcast %cst_9 : f32 to vector<32x32xf32>
    %12 = arith.maximumf %10, %11 : vector<32x32xf32>
    %cst_10 = arith.constant dense<0.000000e+00> : vector<32x32xf32>
    %13 = tpu.matmul %12, %2, %cst_10 {dimension_numbers = #tpu.dot_dimension_numbers<[1], [0], [0], [1], [0, 0, 1, 1], [], []>} : vector<32x32xf32>, vector<32x32xf32>, vector<32x32xf32> -> vector<32x32xf32>
    %14 = vector.broadcast %3 : vector<1x32xf32> to vector<32x32xf32>
    %15 = arith.addf %13, %14 : vector<32x32xf32>
    %cst_11 = arith.constant 0.000000e+00 : f32
    %16 = vector.broadcast %cst_11 : f32 to vector<32x32xf32>
    %17 = arith.maximumf %15, %16 : vector<32x32xf32>
    %cst_12 = arith.constant dense<0.000000e+00> : vector<32x32xf32>
    %18 = tpu.matmul %17, %4, %cst_12 {dimension_numbers = #tpu.dot_dimension_numbers<[1], [0], [0], [1], [0, 0, 1, 1], [], []>} : vector<32x32xf32>, vector<32x32xf32>, vector<32x32xf32> -> vector<32x32xf32>
    %19 = vector.broadcast %5 : vector<1x32xf32> to vector<32x32xf32>
    %20 = arith.addf %18, %19 : vector<32x32xf32>
    %cst_13 = arith.constant 0.000000e+00 : f32
    %21 = vector.broadcast %cst_13 : f32 to vector<32x32xf32>
    %22 = arith.maximumf %20, %21 : vector<32x32xf32>
    %23 = vector.shape_cast %22 : vector<32x32xf32> to vector<2x16x32xf32>
    %24 = vector.extract_strided_slice %23 {offsets = [0, 0, 0], sizes = [2, 8, 32], strides = [1, 1, 1]} : vector<2x16x32xf32> to vector<2x8x32xf32>
    %25 = vector.extract_strided_slice %23 {offsets = [0, 8, 0], sizes = [2, 8, 32], strides = [1, 1, 1]} : vector<2x16x32xf32> to vector<2x8x32xf32>
    %cst_14 = arith.constant dense<0.000000e+00> : vector<2x8x8xf32>
    %26 = tpu.matmul %24, %25, %cst_14 {dimension_numbers = #tpu.dot_dimension_numbers<[2], [2], [1], [1], [0, 0, 0, 1, 1, 1], [0], [0]>} : vector<2x8x32xf32>, vector<2x8x32xf32>, vector<2x8x8xf32> -> vector<2x8x8xf32>
    %27 = arith.mulf %25, %25 : vector<2x8x32xf32>
    %cst_15 = arith.constant dense<0.000000e+00> : vector<2x8xf32>
    %28 = vector.multi_reduction <add>, %27, %cst_15 [2] : vector<2x8x32xf32> to vector<2x8xf32>
    %29 = vector.shape_cast %28 : vector<2x8xf32> to vector<2x1x8xf32>
    %cst_16 = arith.constant 2.000000e+00 : f32
    %30 = vector.broadcast %cst_16 : f32 to vector<2x8x8xf32>
    %31 = arith.mulf %30, %26 : vector<2x8x8xf32>
    %32 = vector.broadcast %29 : vector<2x1x8xf32> to vector<2x8x8xf32>
    %33 = arith.subf %31, %32 : vector<2x8x8xf32>
    %cst_17 = arith.constant 5.000000e-01 : f32
    %34 = vector.broadcast %cst_17 : f32 to vector<2x8x8xf32>
    %35 = arith.mulf %33, %34 : vector<2x8x8xf32>
    %cst_18 = arith.constant dense<0xFF800000> : vector<2x8xf32>
    %36 = vector.multi_reduction <maximumf>, %35, %cst_18 [2] : vector<2x8x8xf32> to vector<2x8xf32>
    %37 = vector.shape_cast %36 : vector<2x8xf32> to vector<2x8x1xf32>
    %38 = vector.broadcast %37 : vector<2x8x1xf32> to vector<2x8x8xf32>
    %39 = arith.subf %35, %38 : vector<2x8x8xf32>
    %40 = math.exp %39 : vector<2x8x8xf32>
    %c0_19 = arith.constant 0 : index
    %c0_20 = arith.constant 0 : index
    %c0_21 = arith.constant 0 : index
    %41 = vector.load %arg2[%c0_19, %c0_20, %c0_21] : memref<2x8x1xf32, #tpu.memory_space<vmem>>, vector<2x8x1xf32>
    %cst_22 = arith.constant dense<0.000000e+00> : vector<2x8x1xf32>
    %42 = tpu.matmul %40, %41, %cst_22 {dimension_numbers = #tpu.dot_dimension_numbers<[2], [1], [1], [2], [0, 0, 0, 1, 1, 2], [0], [0]>} : vector<2x8x8xf32>, vector<2x8x1xf32>, vector<2x8x1xf32> -> vector<2x8x1xf32>
    %cst_23 = arith.constant dense<0.000000e+00> : vector<2x8xf32>
    %43 = vector.multi_reduction <add>, %40, %cst_23 [2] : vector<2x8x8xf32> to vector<2x8xf32>
    %44 = vector.shape_cast %43 : vector<2x8xf32> to vector<2x8x1xf32>
    %45 = tpu.reciprocal %44 : vector<2x8x1xf32> -> vector<2x8x1xf32>
    %46 = arith.mulf %42, %45 : vector<2x8x1xf32>
    %c0_24 = arith.constant 0 : index
    %c0_25 = arith.constant 0 : index
    %c0_26 = arith.constant 0 : index
    %47 = vector.load %arg4[%c0_24, %c0_25, %c0_26] : memref<2x8x1xf32, #tpu.memory_space<vmem>>, vector<2x8x1xf32>
    tpu.vector_store %arg4[%c0_24, %c0_25, %c0_26], %46 {strides = array<i32>} : memref<2x8x1xf32, #tpu.memory_space<vmem>>, vector<2x8x1xf32>,
    return
  }
  func.func @transform_0(%arg0: i32) -> (i32, i32, i32) {
    %c0_i32 = arith.constant 0 : i32
    %c0_i32_0 = arith.constant 0 : i32
    %c0_i32_1 = arith.constant 0 : i32
    return %arg0, %c0_i32, %c0_i32_0 : i32, i32, i32
  }
  func.func @transform_1(%arg0: i32) -> (i32, i32, i32) {
    %c0_i32 = arith.constant 0 : i32
    %c0_i32_0 = arith.constant 0 : i32
    %c0_i32_1 = arith.constant 0 : i32
    return %arg0, %c0_i32, %c0_i32_0 : i32, i32, i32
  }
  func.func @transform_2(%arg0: i32) -> (i32, i32) {
    %c0_i32 = arith.constant 0 : i32
    %c0_i32_0 = arith.constant 0 : i32
    %c0_i32_1 = arith.constant 0 : i32
    return %c0_i32, %c0_i32_0 : i32, i32
  }
  func.func @transform_3(%arg0: i32) -> (i32, i32, i32) {
    %c0_i32 = arith.constant 0 : i32
    %c0_i32_0 = arith.constant 0 : i32
    %c0_i32_1 = arith.constant 0 : i32
    return %arg0, %c0_i32, %c0_i32_0 : i32, i32, i32
  }
}

</mosaic_0001>

<bundles_post_ra>
// kernel: tpu_custom_call.1
= control target key start
LH: loop header
LB: loop body
LE: loop exit
PB: predicated region body
PF: predicated region fallthrough
CT: control target
= control target key end

     0   :  { %s696_s12 = smov 0   ;;  %s785_s0 = inlined_call_operand.vmem [shape: f32[4,16,16], index: 0, kind: input, shape index: {}]   ;;  %s786_s1 = inlined_call_operand.vmem [shape: f32[4,8,1], index: 1, kind: input, shape index: {}]   ;;  %s787_s2 = inlined_call_operand.vmem [shape: f32[104,32], index: 2, kind: input, shape index: {}]   ;;  %s788_s3 = inlined_call_operand.vmem [shape: f32[4,8,1], index: 3, kind: output, shape index: {}]  }
   0x1 LB: > { %s616_s13 = sadd.s32 4294967295, %s674_s12   ;;  %p620_p0 = scmp.ge.s32.totalorder %s674_s12, 1  ;;  %s674_s12 = sphi %s696_s12, %s13_s12  }
   0x2   : > { %p150_p1 = scmp.lt.s32.totalorder %s674_s12, 3 }
   0x4   : > { %p151_p2 = pnand %p620_p0, %p150_p1 }
   0x5   : > { %s621_s18 = sshll.u32 (!%p151_p2), %s616_s13, 1 }
   0x6   : > { %154 = sbr.rel (%p151_p2) target bundleno = 841 (0x349), region = 32  ;;  %p181_p3 = scmp.lt.s32.totalorder (!%p151_p2), %s621_s18, 3 }
   0xb   : > { %v200_v0 = vld [vmem:[%s787_s2 + $0x8] sm:$0xff]  ;;  %v199_v1 = vld [vmem:[%s787_s2] sm:$0xff]  ;;  %v205_v2 = vld [vmem:[%s787_s2 + $0x30] sm:$0xff]  ;;  %s790_s18 = smov (!%p181_p3, %s621_s18), 3  ;;  %vm217_vm0 = vcmask 130048   ;;  %vm264_vm1 = vcmask 261120   ;;  %v420_v57 = vlaneseq }
   0xc   : > { %244 = vmatpush.msra.mxu0 %v200_v0  ;;  %289 = vmatpush.msra.mxu1 %v205_v2  ;;  %s648_s21 = sshll.u32 %s790_s18, 4  ;;  %v204_v7 = vld [vmem:[%s787_s2 + $0x28] sm:$0xff]  ;;  %v203_v8 = vld [vmem:[%s787_s2 + $0x20] sm:$0xff]  ;;  %v202_v9 = vld [vmem:[%s787_s2 + $0x18] sm:$0xff]  ;;  %vm448_vm2 = vcmask 64512   ;;  %s625_s20 = sshll.u32 %s790_s18, 3 }
   0xd   : > { %s185_s24 = scalar_lea.vmem %s785_s0, %s648_s21  ;;  %v657_v10 = vld [vmem:[%s787_s2 + $0x10] ss:$0 sm:$0xff]  ;;  %v210_v11 = vld [vmem:[%s787_s2 + $0x58] sm:$0xff]  ;;  %v208_v25 = vld [vmem:[%s787_s2 + $0x48] sm:$0xff]  ;;  %v421_v58 = vand.u32 127, %v420_v57  ;;  %s191_s23 = scalar_lea.vmem %s786_s1, %s625_s20  ;;  %vm545_vm7 = vcmask 7168  }
   0xe   : > { %245 = vmatpush.msra.mxu0 %v199_v1  ;;  %v212_v3 = vld [vmem:[%s185_s24] sm:$0xff]  ;;  %v213_v4 = vld [vmem:[%s185_s24 + $0x8] sm:$0xff]  ;;  %v214_v5 = vld [vmem:[%s185_s24 + $0x10] sm:$0xff]  ;;  %290 = vmatpush.msra.mxu1 %v204_v7  ;;  %s197_s26 = scalar_lea.vmem %s788_s3, %s625_s20 }
   0xf   : > { %628 = vmatmul.msk.f32.vlgmr.msra.gmra.mxu0 %vm217_vm0, %v212_v3  ;;  %v215_v6 = vld [vmem:[%s185_s24 + $0x18] sm:$0xff]  ;;  %335 = vmatpush.msra.mxu2 %v210_v11  ;;  %v209_v24 = vld [vmem:[%s787_s2 + $0x50] sm:$0xff]  ;;  %v207_v26 = vld [vmem:[%s787_s2 + $0x40] sm:$0xff] }
  0x10   : > { %291 = vmatpush.msra.mxu1 %v203_v8  ;;  %v658_v27 = vld [vmem:[%s787_s2 + $0x38] ss:$0 sm:$0xff]  ;;  %v659_v41 = vld [vmem:[%s787_s2 + $0x60] ss:$0 sm:$0xff] }
  0x11   : > { %336 = vmatpush.msra.mxu2 %v209_v24 }
  0x12   : > { %292 = vmatpush.msra.mxu1 %v202_v9  ;;  %v461_v9 = vld [vmem:[%s191_s23] sm:$0xff] }
  0x13   : > { %337 = vmatpush.msra.mxu2 %v208_v25 }
  0x15   : > { %338 = vmatpush.msra.mxu2 %v207_v26 }
  0x17   : > { %629 = vmatmul.msk.f32.gmra.mxu0 %vm217_vm0, %v213_v4 }
  0x1f   : > { %630 = vmatmul.msk.f32.gmra.mxu0 %vm217_vm0, %v214_v5 }
  0x27   : > { %631 = vmatmul.msk.f32.gmra.mxu0 %vm217_vm0, %v215_v6 }
  0x8c   : > { %v247_v12 = vpop.f32.mrf.mxu0 }
  0x8d   : > { %v248_v13 = vadd.f32 %v657_v10, %v247_v12 }
  0x8f   : > { %v259_v14 = vmax.f32 %v248_v13, 0.0 }
  0x91   : > { %632 = vmatmul.msk.f32.vlgmr.msra.gmra.mxu1 %vm264_vm1, %v259_v14 }
  0x94   : > { %v250_v15 = vpop.f32.mrf.mxu0 }
  0x95   : > { %v251_v16 = vadd.f32 %v657_v10, %v250_v15 }
  0x97   : > { %v260_v17 = vmax.f32 %v251_v16, 0.0 }
  0x99   : > { %633 = vmatmul.msk.f32.gmra.mxu1 %vm264_vm1, %v260_v17 }
  0x9c   : > { %v253_v18 = vpop.f32.mrf.mxu0 }
  0x9d   : > { %v254_v19 = vadd.f32 %v657_v10, %v253_v18 }
  0x9f   : > { %v261_v20 = vmax.f32 %v254_v19, 0.0 }
  0xa1   : > { %634 = vmatmul.msk.f32.gmra.mxu1 %vm264_vm1, %v261_v20 }
  0xa4   : > { %v256_v21 = vpop.f32.mrf.mxu0 }
  0xa5   : > { %v257_v22 = vadd.f32 %v657_v10, %v256_v21  ;;  %v462_v10 = vld [vmem:[%s191_s23 + $0x8] sm:$0xff] }
  0xa7   : > { %v262_v23 = vmax.f32 %v257_v22, 0.0 }
  0xa9   : > { %635 = vmatmul.msk.f32.gmra.mxu1 %vm264_vm1, %v262_v23 }
 0x10e   : > { %v294_v28 = vpop.f32.mrf.mxu1 }
 0x10f   : > { %v295_v29 = vadd.f32 %v658_v27, %v294_v28 }
 0x111   : > { %v306_v30 = vmax.f32 %v295_v29, 0.0 }
 0x113   : > { %636 = vmatmul.msk.f32.vlgmr.msra.gmra.mxu2 %vm264_vm1, %v306_v30 }
 0x116   : > { %v297_v31 = vpop.f32.mrf.mxu1 }
 0x117   : > { %v298_v32 = vadd.f32 %v658_v27, %v297_v31 }
 0x119   : > { %v307_v33 = vmax.f32 %v298_v32, 0.0 }
 0x11b   : > { %637 = vmatmul.msk.f32.gmra.mxu2 %vm264_vm1, %v307_v33 }
 0x11e   : > { %v300_v34 = vpop.f32.mrf.mxu1 }
 0x11f   : > { %v301_v35 = vadd.f32 %v658_v27, %v300_v34 }
 0x121   : > { %v308_v36 = vmax.f32 %v301_v35, 0.0 }
 0x123   : > { %638 = vmatmul.msk.f32.gmra.mxu2 %vm264_vm1, %v308_v36 }
 0x126   : > { %v303_v37 = vpop.f32.mrf.mxu1 }
 0x127   : > { %v304_v38 = vadd.f32 %v658_v27, %v303_v37 }
 0x129   : > { %v309_v39 = vmax.f32 %v304_v38, 0.0 }
 0x12b   : > { %639 = vmatmul.msk.f32.gmra.mxu2 %vm264_vm1, %v309_v39 }
 0x196   : > { %v340_v40 = vpop.f32.mrf.mxu2 }
 0x197   : > { %v341_v44 = vadd.f32 %v659_v41, %v340_v40 }
 0x199   : > { %v352_v47 = vmax.f32 %v341_v44, 0.0 }
 0x19e   : > { %v343_v42 = vpop.f32.mrf.mxu2 }
 0x19f   : > { %v344_v43 = vadd.f32 %v659_v41, %v343_v42 }
 0x1a1   : > { %v353_v45 = vmax.f32 %v344_v43, 0.0 }
 0x1a3   : > { %640 = vmatpush.xpose.msk.msra.mxu3 %vm264_vm1, %v353_v45  ;;  %v408_v46 = vmul.f32 %v353_v45, %v353_v45 }
 0x1a5   : > { %v410_v48 = vsel %vm264_vm1, %v408_v46, 0.0 }
 0x1a6   : > { %v346_v49 = vpop.f32.mrf.mxu2  ;;  %411 = vadd.xlane.f32.xlu0 %v410_v48  ;;  %641 = vmatmul.msk.f32.vlgmr.msra.gmra.mxu3 %vm264_vm1, %v352_v47 }
 0x1a7   : > { %v347_v52 = vadd.f32 %v659_v41, %v346_v49 }
 0x1a9   : > { %v354_v55 = vmax.f32 %v347_v52, 0.0 }
 0x1ae   : > { %v349_v50 = vpop.f32.mrf.mxu2 }
 0x1af   : > { %v350_v51 = vadd.f32 %v659_v41, %v349_v50 }
 0x1b1   : > { %v355_v53 = vmax.f32 %v350_v51, 0.0 }
 0x1b3   : > { %642 = vmatpush.xpose.msk.msrb.mxu3 %vm264_vm1, %v355_v53  ;;  %v409_v54 = vmul.f32 %v355_v53, %v355_v53 }
 0x1b5   : > { %v413_v56 = vsel %vm264_vm1, %v409_v54, 0.0 }
 0x1b6   : > { %414 = vadd.xlane.f32.xlu0 %v413_v56  ;;  %643 = vmatmul.msk.f32.vlgmr.msrb.gmra.mxu3 %vm264_vm1, %v354_v55 }
 0x1b7   : > { %481 = vmatpush.msra.mxu3 %v461_v9 }
 0x1b9   : > { %504 = vmatpush.msrb.mxu3 %v462_v10 }
 0x219   : > { %v412_v59 = vpop.xlane.xlu0 %411 }
 0x21a   : > { %v422_v61 = vperm.slane %v412_v59, %v421_v58 }
 0x229   : > { %v379_v60 = vpop.f32.mrf.mxu3  ;;  %v415_v2 = vpop.xlane.xlu0 %414 }
 0x22a   : > { %v416_v62 = vmul.f32 2.0, %v379_v60  ;;  %v423_v4 = vperm.slane %v415_v2, %v421_v58 }
 0x22c   : > { %v444_v63 = vsub.f32 %v416_v62, %v422_v61 }
 0x22e   : > { %v446_v0 = vmul.f32 0.5, %v444_v63 }
 0x230   : > { %v449_v1 = vsel %vm448_vm2, %v446_v0, -inf }
 0x231   : > { %450 = vmax.xlane.f32.xlu1 %v449_v1 }
 0x239   : > { %v405_v3 = vpop.f32.mrf.mxu3 }
 0x23a   : > { %v417_v5 = vmul.f32 2.0, %v405_v3 }
 0x23c   : > { %v445_v6 = vsub.f32 %v417_v5, %v423_v4 }
 0x23e   : > { %v447_v7 = vmul.f32 0.5, %v445_v6 }
 0x240   : > { %v452_v8 = vsel %vm448_vm2, %v447_v7, -inf }
 0x241   : > { %453 = vmax.xlane.f32.xlu1 %v452_v8 }
 0x2a4   : > { %v451_v11 = vpop.xlane.xlu1 %450 }
 0x2a5   : > { %v455_v12 = vsub.f32 %v446_v0, %v451_v11 }
 0x2a7   : > { %v457_v13 = vmul.f32 1.442695, %v455_v12 }
 0x2a9   : > { %660 = vpow2.f32 %v457_v13 }
 0x2af   : > { %v661_v14 = vpop.eup %660 }
 0x2b0   : > { %644 = vmatmul.msk.f32.vlgmr.msra.gmra.mxu3 %vm448_vm2, %v661_v14  ;;  %v509_v15 = vsel %vm448_vm2, %v661_v14, 0.0 }
 0x2b1   : > { %510 = vadd.xlane.f32.xlu2 %v509_v15 }
 0x2b4   : > { %v454_v16 = vpop.xlane.xlu1 %453 }
 0x2b5   : > { %v456_v17 = vsub.f32 %v447_v7, %v454_v16 }
 0x2b7   : > { %v459_v18 = vmul.f32 1.442695, %v456_v17 }
 0x2b9   : > { %662 = vpow2.f32 %v459_v18 }
 0x2bf   : > { %v663_v19 = vpop.eup %662 }
 0x2c0   : > { %645 = vmatmul.msk.f32.vlgmr.msrb.gmra.mxu3 %vm448_vm2, %v663_v19  ;;  %v512_v20 = vsel %vm448_vm2, %v663_v19, 0.0 }
 0x2c1   : > { %513 = vadd.xlane.f32.xlu2 %v512_v20 }
 0x324   : > { %v511_v21 = vpop.xlane.xlu2 %510 }
 0x325   : > { %664 = vrcp.f32 %v511_v21  ;;  %v526_v25 = vand.u32 2147483648, %v511_v21  ;;  %v524_v27 = vand.u32 2147483647, %v511_v21  ;;  %vm520_vm4 = vweird.f32 %v511_v21 }
 0x327   : > { %v527_v29 = vor.u32 1.1754944e-38, %v526_v25  ;;  %vm525_vm6 = vcmp.eq.f32.partialorder %v524_v27, 8.507059e+37 }
 0x32b   : > { %v665_v22 = vpop.eup %664 }
 0x32c   : > { %v516_v23 = vmul.f32 %v665_v22, %v511_v21  ;;  %vm521_vm3 = vweird.f32 %v665_v22 }
 0x32d   : > { %vm522_vm5 = vmor %vm520_vm4, %vm521_vm3 }
 0x32e   : > { %v517_v24 = vsub.f32 1.0, %v516_v23 }
 0x330   : > { %v518_v26 = vmul.f32 %v665_v22, %v517_v24 }
 0x332   : > { %v519_v28 = vadd.f32 %v665_v22, %v518_v26 }
 0x333   : > { %v483_v32 = vpop.f32.mrf.mxu3 }
 0x334   : > { %v523_v30 = vsel %vm522_vm5, %v665_v22, %v519_v28  ;;  %v514_v31 = vpop.xlane.xlu2 %513 }
 0x335   : > { %v528_v33 = vsel %vm525_vm6, %v527_v29, %v523_v30  ;;  %666 = vrcp.f32 %v514_v31  ;;  %v540_v38 = vand.u32 2147483648, %v514_v31  ;;  %v538_v40 = vand.u32 2147483647, %v514_v31 }
 0x336   : > { %v543_v34 = vmul.f32 %v528_v33, %v483_v32  ;;  %vm534_vm9 = vweird.f32 %v514_v31 }
 0x337   : > { %v541_v42 = vor.u32 1.1754944e-38, %v540_v38  ;;  %vm539_vm11 = vcmp.eq.f32.partialorder %v538_v40, 8.507059e+37 }
 0x338   : > { %546 = vst.msk [vmem:[%s197_s26] sm:$0xff] %vm545_vm7, %v543_v34 }
 0x33b   : > { %v667_v35 = vpop.eup %666 }
 0x33c   : > { %v530_v36 = vmul.f32 %v667_v35, %v514_v31  ;;  %vm535_vm8 = vweird.f32 %v667_v35 }
 0x33d   : > { %vm536_vm10 = vmor %vm534_vm9, %vm535_vm8 }
 0x33e   : > { %v531_v37 = vsub.f32 1.0, %v530_v36 }
 0x340   : > { %v532_v39 = vmul.f32 %v667_v35, %v531_v37 }
 0x342   : > { %v533_v41 = vadd.f32 %v667_v35, %v532_v39 }
 0x343   : > { %v506_v44 = vpop.f32.mrf.mxu3 }
 0x344   : > { %v537_v43 = vsel %vm536_vm10, %v667_v35, %v533_v41 }
 0x345   : > { %v542_v45 = vsel %vm539_vm11, %v541_v42, %v537_v43 }
 0x346   : > { %v544_v46 = vmul.f32 %v542_v45, %v506_v44 }
 0x348   : > { %547 = vst.msk [vmem:[%s197_s26 + $0x8] sm:$0xff] %vm545_vm7, %v544_v46 }
 0x349 PF: > { %s13_s12 = sadd.s32 1, %s674_s12  }
 0x34a   : > { %p10_p4 = scmp.ge.s32.totalorder %s13_s12, 4  }
 0x34c   :  { %12 = sbr.rel (!%p10_p4) target bundleno = 1 (0x1), region = 65 }

</bundles_post_ra>
